<compile_context>
chip_gen: v6e
topology: v6e:2x2x1
jax: 0.10.0
libtpu: 0.0.40
codegen_flags: <defaults>
</compile_context>

<pallas_src>
import jax
import jax.numpy as jnp
from jax import lax
from jax.experimental import pallas as pl
from jax.experimental.pallas import tpu as pltpu


def _crnn_kernel(slab_ref, w_ref, b_ref, o_ref):
    # slab_ref: (1, KKC, col_tile) bf16  im2col slab (lanes = spatial positions)
    # w_ref:    (Ch, KKC)          bf16  fused weight matrix
    # b_ref:    (Ch, 1)            f32   summed bias
    # o_ref:    (1, Ch, col_tile)        lane-dense output block
    acc = jnp.dot(w_ref[...], slab_ref[0],
                  preferred_element_type=jnp.float32)          # (Ch, col_tile) f32
    acc = acc + b_ref[...]                                     # bias, lane broadcast
    o_ref[0] = jnp.maximum(acc, 0.01 * acc).astype(o_ref.dtype)  # LeakyReLU(0.01)


def _im2col_nchw(x_pad, H, W, K, d):
    """(N, C, Hp, Wp) -> (N, K*K*C, H*W); combined channel index ordered
    (kh, kw, c) with c fastest (matches _w_matrix column ordering)."""
    taps = [x_pad[:, :, kh * d:kh * d + H, kw * d:kw * d + W]
            for kh in range(K) for kw in range(K)]
    slab = jnp.concatenate(taps, axis=1)
    return slab.reshape(x_pad.shape[0], slab.shape[1], H * W)


def _w_matrix(w_oihw):
    """(Cout, Cin, K, K) -> (Cout, K*K*Cin); column order (kh, kw, cin), cin fastest."""
    cout = w_oihw.shape[0]
    return jnp.transpose(w_oihw, (0, 2, 3, 1)).reshape(cout, -1)


def crnn_cell_forward(x_nchw, h_nchw, params, hi_nchw=None, *,
                      kernel_size, dilation, out_dtype=None):
    """Forward pass matching PyTorch CRNNcell.forward (NCHW in, NCHW out)."""
    K, d = kernel_size, dilation
    use_iter = hi_nchw is not None
    N, Cin, H, W = x_nchw.shape
    Ch = h_nchw.shape[1]
    HW = H * W
    out_dtype = x_nchw.dtype if out_dtype is None else out_dtype

    # "same" geometry of the dilated convs (padding == dilation) needs K == 3;
    # the ih2ih conv (padding == K // 2, dilation 1) is "same" for odd K.
    assert K == 3, "CRNNcell geometry (padding == dilation) is 'same' only for K == 3"

    # ---- fused i2h + h2h: concat channels, pad once, bf16 im2col slab ----
    xh = jnp.concatenate([x_nchw, h_nchw], axis=1).astype(jnp.bfloat16)  # (N, Cf, H, W)
    xh_pad = jnp.pad(xh, ((0, 0), (0, 0), (d, d), (d, d)))
    slab = _im2col_nchw(xh_pad, H, W, K, d)                              # (N, K*K*Cf, HW)

    # weights fused at OIHW stage so per-tap channel ordering matches the slab
    w_xh = jnp.concatenate([params["w_i2h"], params["w_h2h"]], axis=1)   # (Ch, Cf, K, K)
    w_mat = _w_matrix(w_xh)                                              # (Ch, K*K*Cf)
    bias = params["b_i2h"] + params["b_h2h"]

    if use_iter:
        p = K // 2
        hi_pad = jnp.pad(hi_nchw.astype(jnp.bfloat16),
                         ((0, 0), (0, 0), (p, p), (p, p)))
        slab = jnp.concatenate([slab, _im2col_nchw(hi_pad, H, W, K, 1)], axis=1)
        w_mat = jnp.concatenate([w_mat, _w_matrix(params["w_ih2ih"])], axis=1)
        bias = bias + params["b_ih2ih"]

    w_mat = w_mat.astype(jnp.bfloat16)
    bias = bias.reshape(Ch, 1).astype(jnp.float32)
    KKC = slab.shape[1]

    # ---- spatial (column) tiling over H*W ----
    # Keeps each slab block <= ~2 MiB as H*W grows and guarantees >= 2 parallel
    # steps for v7x's two TensorCores when N == 1.  At the demo shape: 1 tile.
    n_ctiles, col_tile = 1, HW
    while ((N == 1 and n_ctiles < 2) or KKC * col_tile * 2 > (2 << 20)) \
            and col_tile % 256 == 0:
        n_ctiles *= 2
        col_tile //= 2

    flops = 2 * N * Ch * KKC * HW
    bytes_accessed = int(slab.size * slab.dtype.itemsize
                         + w_mat.size * w_mat.dtype.itemsize
                         + bias.size * bias.dtype.itemsize
                         + N * Ch * HW * jnp.dtype(out_dtype).itemsize)

    out = pl.pallas_call(
        _crnn_kernel,
        out_shape=jax.ShapeDtypeStruct((N, Ch, HW), out_dtype),
        grid=(N, n_ctiles),
        in_specs=[
            pl.BlockSpec((1, KKC, col_tile), lambda n, c: (n, 0, c)),
            pl.BlockSpec((Ch, KKC), lambda n, c: (0, 0)),
            pl.BlockSpec((Ch, 1), lambda n, c: (0, 0)),
        ],
        out_specs=pl.BlockSpec((1, Ch, col_tile), lambda n, c: (n, 0, c)),
        compiler_params=pltpu.CompilerParams(
            dimension_semantics=("parallel", "parallel")),
        cost_estimate=pl.CostEstimate(flops=int(flops), transcendentals=0,
                                      bytes_accessed=bytes_accessed),
    )(slab, w_mat, bias)

    # (N, Ch, H*W) -> NCHW is a pure reshape (no transpose, no relayout).
    return out.reshape(N, Ch, H, W)


def _reference_forward(x, h, params, hi, *, kernel_size, dilation):
    """Pure-JAX (XLA conv) reference for validation."""
    K, d = kernel_size, dilation
    dn = ("NCHW", "OIHW", "NCHW")

    def conv(inp, w, b, pad, dil):
        o = lax.conv_general_dilated(inp, w, (1, 1), [(pad, pad), (pad, pad)],
                                     rhs_dilation=(dil, dil),
                                     dimension_numbers=dn)
        return o + b.reshape(1, -1, 1, 1)

    y = conv(x, params["w_i2h"], params["b_i2h"], d, d)
    y = y + conv(h, params["w_h2h"], params["b_h2h"], d, d)
    if hi is not None:
        y = y + conv(hi, params["w_ih2ih"], params["b_ih2ih"], K // 2, 1)
    return jnp.where(y > 0, y, 0.01 * y)


if __name__ == "__main__":
    N, Cin, Ch, H, W = 2, 4, 32, 16, 16
    K, dilation = 3, 2

    key = jax.random.PRNGKey(0)
    ks = jax.random.split(key, 9)

    x = jax.random.normal(ks[0], (N, Cin, H, W), jnp.float32)
    h = jax.random.normal(ks[1], (N, Ch, H, W), jnp.float32)
    hi = jax.random.normal(ks[2], (N, Ch, H, W), jnp.float32)

    params = {
        "w_i2h":   0.1 * jax.random.normal(ks[3], (Ch, Cin, K, K), jnp.float32),
        "b_i2h":   0.1 * jax.random.normal(ks[4], (Ch,), jnp.float32),
        "w_h2h":   0.1 * jax.random.normal(ks[5], (Ch, Ch, K, K), jnp.float32),
        "b_h2h":   0.1 * jax.random.normal(ks[6], (Ch,), jnp.float32),
        "w_ih2ih": 0.1 * jax.random.normal(ks[7], (Ch, Ch, K, K), jnp.float32),
        "b_ih2ih": 0.1 * jax.random.normal(ks[8], (Ch,), jnp.float32),
    }

    # iteration=True path (all three convs)
    out = crnn_cell_forward(x, h, params, hi, kernel_size=K, dilation=dilation)
    out = jax.block_until_ready(out)

    # iteration=False path (hidden_iteration=None)
    out_noiter = crnn_cell_forward(x, h, params, None,
                                   kernel_size=K, dilation=dilation)
    out_noiter = jax.block_until_ready(out_noiter)

    ref = _reference_forward(x, h, params, hi, kernel_size=K, dilation=dilation)
    ref_noiter = _reference_forward(x, h, params, None,
                                    kernel_size=K, dilation=dilation)

    assert out.shape == (N, Ch, H, W)
    assert out_noiter.shape == (N, Ch, H, W)
    assert jnp.allclose(out, ref, rtol=5e-2, atol=5e-2)
    assert jnp.allclose(out_noiter, ref_noiter, rtol=5e-2, atol=5e-2)

    print("KERNEL_OK")
</pallas_src>

<mosaic_0001>
module attributes {stable_mosaic.version = 11 : i64} {
  func.func @_crnn_kernel(%arg0: i32, %arg1: i32, %arg2: memref<1x612x256xbf16, #tpu.memory_space<vmem>>, %arg3: memref<32x612xbf16, #tpu.memory_space<vmem>>, %arg4: memref<32x1xf32, #tpu.memory_space<vmem>>, %arg5: memref<1x32x256xf32, #tpu.memory_space<vmem>>) attributes {dimension_semantics = [#tpu.dimension_semantics<parallel>, #tpu.dimension_semantics<parallel>], iteration_bounds = array<i64: 2, 1>, scalar_prefetch = 0 : i64, scratch_operands = 0 : i64, tpu.core_type = #tpu.core_type<tc>, window_params = [{transform_indices = @transform_0, window_bounds = array<i64: 1, 612, 256>}, {pipeline_mode = #tpu.pipeline_mode<synchronous>, transform_indices = @transform_1, window_bounds = array<i64: 32, 612>}, {pipeline_mode = #tpu.pipeline_mode<synchronous>, transform_indices = @transform_2, window_bounds = array<i64: 32, 1>}, {transform_indices = @transform_3, window_bounds = array<i64: 1, 32, 256>}]} {
    %c0 = arith.constant 0 : index
    %c0_0 = arith.constant 0 : index
    %0 = vector.load %arg3[%c0, %c0_0] : memref<32x612xbf16, #tpu.memory_space<vmem>>, vector<32x612xbf16>
    %c0_1 = arith.constant 0 : index
    %c0_2 = arith.constant 0 : index
    %c0_3 = arith.constant 0 : index
    %1 = vector.load %arg2[%c0_1, %c0_2, %c0_3] : memref<1x612x256xbf16, #tpu.memory_space<vmem>>, vector<1x612x256xbf16>
    %2 = vector.shape_cast %1 : vector<1x612x256xbf16> to vector<612x256xbf16>
    %cst = arith.constant dense<0.000000e+00> : vector<32x256xf32>
    %3 = tpu.matmul %0, %2, %cst {dimension_numbers = #tpu.dot_dimension_numbers<[1], [0], [0], [1], [0, 0, 1, 1], [], []>} : vector<32x612xbf16>, vector<612x256xbf16>, vector<32x256xf32> -> vector<32x256xf32>
    %c0_4 = arith.constant 0 : index
    %c0_5 = arith.constant 0 : index
    %4 = vector.load %arg4[%c0_4, %c0_5] : memref<32x1xf32, #tpu.memory_space<vmem>>, vector<32x1xf32>
    %5 = vector.broadcast %4 : vector<32x1xf32> to vector<32x256xf32>
    %6 = arith.addf %3, %5 : vector<32x256xf32>
    %cst_6 = arith.constant 0.00999999977 : f32
    %7 = vector.broadcast %cst_6 : f32 to vector<32x256xf32>
    %8 = arith.mulf %7, %6 : vector<32x256xf32>
    %9 = arith.maximumf %6, %8 : vector<32x256xf32>
    %c0_7 = arith.constant 0 : index
    %c0_8 = arith.constant 0 : index
    %c0_9 = arith.constant 0 : index
    %10 = vector.load %arg5[%c0_7, %c0_8, %c0_9] : memref<1x32x256xf32, #tpu.memory_space<vmem>>, vector<1x32x256xf32>
    %11 = vector.shape_cast %10 : vector<1x32x256xf32> to vector<32x256xf32>
    %12 = vector.shape_cast %9 : vector<32x256xf32> to vector<1x32x256xf32>
    tpu.vector_store %arg5[%c0_7, %c0_8, %c0_9], %12 {strides = array<i32>} : memref<1x32x256xf32, #tpu.memory_space<vmem>>, vector<1x32x256xf32>,
    return
  }
  func.func @transform_0(%arg0: i32, %arg1: i32) -> (i32, i32, i32) {
    %c0_i32 = arith.constant 0 : i32
    %c0_i32_0 = arith.constant 0 : i32
    return %arg0, %c0_i32, %arg1 : i32, i32, i32
  }
  func.func @transform_1(%arg0: i32, %arg1: i32) -> (i32, i32) {
    %c0_i32 = arith.constant 0 : i32
    %c0_i32_0 = arith.constant 0 : i32
    %c0_i32_1 = arith.constant 0 : i32
    return %c0_i32, %c0_i32_0 : i32, i32
  }
  func.func @transform_2(%arg0: i32, %arg1: i32) -> (i32, i32) {
    %c0_i32 = arith.constant 0 : i32
    %c0_i32_0 = arith.constant 0 : i32
    %c0_i32_1 = arith.constant 0 : i32
    return %c0_i32, %c0_i32_0 : i32, i32
  }
  func.func @transform_3(%arg0: i32, %arg1: i32) -> (i32, i32, i32) {
    %c0_i32 = arith.constant 0 : i32
    %c0_i32_0 = arith.constant 0 : i32
    return %arg0, %c0_i32, %arg1 : i32, i32, i32
  }
}

</mosaic_0001>

<bundles_post_ra>
// kernel: tpu_custom_call.1
= control target key start
LH: loop header
LB: loop body
LE: loop exit
PB: predicated region body
PF: predicated region fallthrough
CT: control target
= control target key end

     0   :  { %8 = vsyncpa [#allocation3], 0  ;;  %s1695_s0 = inlined_call_operand.vmem [shape: bf16[2,612,256], index: 0, kind: input, shape index: {}]   ;;  %s1696_s1 = inlined_call_operand.vmem [shape: bf16[32,612], index: 1, kind: input, shape index: {}]   ;;  %s1697_s2 = inlined_call_operand.vmem [shape: f32[32,1], index: 2, kind: input, shape index: {}]   ;;  %s1698_s3 = inlined_call_operand.hbm [shape: f32[2,32,256], index: 3, kind: output, shape index: {}]  }
   0x1   :  { %10 = vsyncpa [#allocation3 + $0x1], 0  ;;  %s1452_s12 = smov 0   ;;  %s1454_s13 = smov 0  }
   0x2   :  { %s1456_s14 = smov 0   ;;  %s1458_s15 = smov 0  }
   0x3   :  { %s1460_s16 = smov 0   ;;  %s1462_s17 = smov 0  }
   0x4 LB: > { %s1041_s18 = sadd.s32 4294967295, %s1426_s17   ;;  %s1042_s19 = sadd.s32 4294967294, %s1426_s17   ;;  %s1426_s17 = sphi %s1462_s17, %s16_s17   ;;  %s1422_s16 = sphi %s1460_s16, %s1705_s16   ;;  %s1418_s15 = sphi %s1458_s15, %s1704_s15   ;;  %s1414_s14 = sphi %s1456_s14, %s1703_s14   ;;  %s1410_s13 = sphi %s1454_s13, %s1702_s13   ;;  %s1406_s12 = sphi %s1452_s12, %s1701_s12  }
   0x5   : > { %s28_s20 = sadd.s32 1, %s1422_s16  ;;  %s107_s21 = sadd.s32 1, %s1414_s14 }
   0x6   : > { %p30_p0 = scmp.ge.s32.totalorder %s28_s20, 2  ;;  %p117_p1 = scmp.ne.s32.totalorder %s1414_s14, %s1410_s13 }
   0x7   : > { %p118_p2 = scmp.eq.s32.totalorder %s1041_s18, 1  ;;  %p123_p3 = scmp.ne.s32.totalorder %s1410_s13, %s1406_s12 }
   0x8   : > { %s1707_s20 = smov (%p30_p0, %s28_s20), 0  ;;  %p124_p5 = scmp.eq.s32.totalorder %s1042_s19, 1 }
   0x9   : > { %p1492_p4 = por %p118_p2, %p117_p1  ;;  %s102_s23 = ssub.s32 %s1422_s16, %s1707_s20 }
   0xa   : > { %p1045_p6 = scmp.ge.s32.totalorder %s1426_s17, 1  ;;  %p105_p7 = scmp.eq.s32.totalorder %s102_s23, 0 }
   0xb   : > { %p1499_p8 = por %p124_p5, %p123_p3  ;;  %p161_p9 = scmp.lt.s32.totalorder %s1426_s17, 3 }
   0xc   : > { %s1505_s25 = scalar_select %p105_p7, %s1414_s14, %s107_s21  }
   0xd   : > { %p162_p10 = pnand %p1045_p6, %p161_p9 }
   0xe   : > { %p190_p11 = scmp.lt.s32.totalorder (!%p162_p10), %s1418_s15, 1  ;;  %s1429_s8 = smov (!%p162_p10), [#allocation2]  }
   0xf   : > { %165 = sbr.rel (%p162_p10) target bundleno = 338 (0x152), region = 32  ;;  %s1354_s9 = sshll.u32 (!%p162_p10), %s1429_s8, 4  ;;  %s1355_s9 = int_to_ptr.vmem [resolvable:$false] %s1354_s9 }
  0x10   : > { %s1356_s10 = scalar_lea.vmem (!%p162_p10), %s1355_s9, 2048 }
  0x14   : > { %v1318_v0 = vld [vmem:[%s1696_s1 + $0x4] ss:$20 sps:$4 sm:$0xff]   ;;  %s191_s28 = scalar_select %p190_p11, %s1418_s15, 1  ;;  %v1321_v1 = vld [vmem:[%s1696_s1 + $0xc] ss:$20 sps:$4 sm:$0xff]   ;;  %v1428_v2 = vmov 0  }
  0x15   : > { %1218 = vset.pattern.permute.xlu0 %v1428_v2  ;;  %1219 = vset.pattern.permute.xlu1 %v1428_v2  ;;  %v290_v57 = vld [vmem:[%s1697_s2] sm:$0xff]  ;;  %v292_v60 = vld [vmem:[%s1697_s2 + $0x10] sm:$0xff]  ;;  %v291_v63 = vld [vmem:[%s1697_s2 + $0x8] sm:$0xff]  ;;  %vm756_vm0 = vcmask 1041408   ;;  %vm749_vm1 = vcmask 818176  }
  0x16   : > { %795 = vmatprep.mubr.bf16.mxu0 %v1318_v0  ;;  %s1159_s4 = smul.u32 616, %s191_s28  ;;  %848 = vmatprep.mubr.bf16.mxu1 %v1321_v1  ;;  %v293_v0 = vld [vmem:[%s1697_s2 + $0x18] sm:$0xff]  ;;  %s1144_s28 = sshll.u32 %s1418_s15, 10 }
  0x17   : > { %296 = vperm.xlu0 %1218, %v290_v57   ;;  %306 = vperm.xlu1 %1219, %v292_v60   ;;  %s1644_s5 = scalar_lea.hbm %s1698_s3, %s1144_s28 }
  0x18   : > { %s1520_s7 = scalar_lea.vmem %s1695_s0, %s1159_s4 }
  0x19   : > { %v1220_v3 = vld [vmem:[%s1520_s7 + $0x74] ss:$8 sps:$4 sm:$0xff]   ;;  %v1224_v5 = vld [vmem:[%s1520_s7 + $0x70] ss:$8 sps:$4 sm:$0xff]   ;;  %v1226_v7 = vld [vmem:[%s1520_s7 + $0x64] ss:$8 sps:$4 sm:$0xff]  }
  0x1a   : > { %v1222_v4 = vld [vmem:[%s1520_s7 + $0x174] ss:$8 sps:$4 sm:$0xff]   ;;  %763 = vmatprep.subr.bf16.mxu0 %v1220_v3  ;;  %v1225_v6 = vld [vmem:[%s1520_s7 + $0x170] ss:$8 sps:$4 sm:$0xff]   ;;  %v1228_v8 = vld [vmem:[%s1520_s7 + $0x164] ss:$8 sps:$4 sm:$0xff]  }
  0x1b   : > { %816 = vmatprep.subr.bf16.mxu1 %v1222_v4  ;;  %764 = vmatpush1.bf16.msra.mxu0 %v1224_v5  ;;  %v1230_v9 = vld [vmem:[%s1520_s7 + $0x60] ss:$8 sps:$4 sm:$0xff]   ;;  %v1232_v11 = vld [vmem:[%s1520_s7 + $0x54] ss:$8 sps:$4 sm:$0xff]   ;;  %v1236_v13 = vld [vmem:[%s1520_s7 + $0x50] ss:$8 sps:$4 sm:$0xff]  }
  0x1c   : > { %817 = vmatpush1.bf16.msra.mxu1 %v1225_v6  ;;  %765 = vmatprep.subr.bf16.mxu0 %v1226_v7  ;;  %v1231_v10 = vld [vmem:[%s1520_s7 + $0x160] ss:$8 sps:$4 sm:$0xff]   ;;  %v1234_v12 = vld [vmem:[%s1520_s7 + $0x154] ss:$8 sps:$4 sm:$0xff]   ;;  %v1237_v14 = vld [vmem:[%s1520_s7 + $0x150] ss:$8 sps:$4 sm:$0xff]  }
  0x1d   : > { %818 = vmatprep.subr.bf16.mxu1 %v1228_v8  ;;  %v1238_v15 = vld [vmem:[%s1520_s7 + $0x44] ss:$8 sps:$4 sm:$0xff]   ;;  %v1242_v17 = vld [vmem:[%s1520_s7 + $0x40] ss:$8 sps:$4 sm:$0xff]   ;;  %v1244_v19 = vld [vmem:[%s1520_s7 + $0x34] ss:$8 sps:$4 sm:$0xff]   ;;  %301 = vperm.xlu0 %1218, %v291_v63  }
  0x1e   : > { %v1240_v16 = vld [vmem:[%s1520_s7 + $0x144] ss:$8 sps:$4 sm:$0xff]   ;;  %v1243_v18 = vld [vmem:[%s1520_s7 + $0x140] ss:$8 sps:$4 sm:$0xff]   ;;  %v1246_v20 = vld [vmem:[%s1520_s7 + $0x134] ss:$8 sps:$4 sm:$0xff]   ;;  %311 = vperm.xlu1 %1219, %v293_v0  }
  0x1f   : > { %766 = vmatpush1.bf16.msra.mxu0 %v1230_v9  ;;  %v1248_v21 = vld [vmem:[%s1520_s7 + $0x30] ss:$8 sps:$4 sm:$0xff]   ;;  %v1250_v23 = vld [vmem:[%s1520_s7 + $0x24] ss:$8 sps:$4 sm:$0xff]   ;;  %v1254_v25 = vld [vmem:[%s1520_s7 + $0x20] ss:$8 sps:$4 sm:$0xff]  }
  0x20   : > { %819 = vmatpush1.bf16.msra.mxu1 %v1231_v10  ;;  %767 = vmatprep.subr.bf16.mxu0 %v1232_v11  ;;  %v1249_v22 = vld [vmem:[%s1520_s7 + $0x130] ss:$8 sps:$4 sm:$0xff]   ;;  %v1252_v24 = vld [vmem:[%s1520_s7 + $0x124] ss:$8 sps:$4 sm:$0xff]   ;;  %v1255_v26 = vld [vmem:[%s1520_s7 + $0x120] ss:$8 sps:$4 sm:$0xff]  }
  0x21   : > { %820 = vmatprep.subr.bf16.mxu1 %v1234_v12  ;;  %v1256_v27 = vld [vmem:[%s1520_s7 + $0x14] ss:$8 sps:$4 sm:$0xff]   ;;  %v1260_v29 = vld [vmem:[%s1520_s7 + $0x10] ss:$8 sps:$4 sm:$0xff]   ;;  %v1262_v31 = vld [vmem:[%s1520_s7 + $0x4] ss:$8 sps:$4 sm:$0xff]  }
  0x22   : > { %v1258_v28 = vld [vmem:[%s1520_s7 + $0x114] ss:$8 sps:$4 sm:$0xff]   ;;  %v1261_v30 = vld [vmem:[%s1520_s7 + $0x110] ss:$8 sps:$4 sm:$0xff]   ;;  %v1264_v32 = vld [vmem:[%s1520_s7 + $0x104] ss:$8 sps:$4 sm:$0xff]  }
  0x23   : > { %768 = vmatpush1.bf16.msra.mxu0 %v1236_v13  ;;  %v1266_v33 = vld [vmem:[%s1520_s7] ss:$8 sps:$4 sm:$0xff]   ;;  %v1268_v35 = vld [vmem:[%s1520_s7 + $0xf4] ss:$8 sps:$4 sm:$0xff]   ;;  %v1272_v37 = vld [vmem:[%s1520_s7 + $0xf0] ss:$8 sps:$4 sm:$0xff]  }
  0x24   : > { %821 = vmatpush1.bf16.msra.mxu1 %v1237_v14  ;;  %769 = vmatprep.subr.bf16.mxu0 %v1238_v15  ;;  %v1267_v34 = vld [vmem:[%s1520_s7 + $0x100] ss:$8 sps:$4 sm:$0xff]   ;;  %v1270_v36 = vld [vmem:[%s1520_s7 + $0x1f4] ss:$8 sps:$4 sm:$0xff]   ;;  %v1273_v38 = vld [vmem:[%s1520_s7 + $0x1f0] ss:$8 sps:$4 sm:$0xff]  }
  0x25   : > { %822 = vmatprep.subr.bf16.mxu1 %v1240_v16  ;;  %v1274_v39 = vld [vmem:[%s1520_s7 + $0xe4] ss:$8 sps:$4 sm:$0xff]   ;;  %v1278_v41 = vld [vmem:[%s1520_s7 + $0xe0] ss:$8 sps:$4 sm:$0xff]   ;;  %v1280_v43 = vld [vmem:[%s1520_s7 + $0xd4] ss:$8 sps:$4 sm:$0xff]  }
  0x26   : > { %v1276_v40 = vld [vmem:[%s1520_s7 + $0x1e4] ss:$8 sps:$4 sm:$0xff]   ;;  %v1279_v42 = vld [vmem:[%s1520_s7 + $0x1e0] ss:$8 sps:$4 sm:$0xff]   ;;  %v1282_v44 = vld [vmem:[%s1520_s7 + $0x1d4] ss:$8 sps:$4 sm:$0xff]  }
  0x27   : > { %770 = vmatpush1.bf16.msra.mxu0 %v1242_v17  ;;  %v1284_v45 = vld [vmem:[%s1520_s7 + $0xd0] ss:$8 sps:$4 sm:$0xff]   ;;  %v1286_v47 = vld [vmem:[%s1520_s7 + $0xc4] ss:$8 sps:$4 sm:$0xff]   ;;  %v1290_v49 = vld [vmem:[%s1520_s7 + $0xc0] ss:$8 sps:$4 sm:$0xff]  }
  0x28   : > { %823 = vmatpush1.bf16.msra.mxu1 %v1243_v18  ;;  %771 = vmatprep.subr.bf16.mxu0 %v1244_v19  ;;  %v1285_v46 = vld [vmem:[%s1520_s7 + $0x1d0] ss:$8 sps:$4 sm:$0xff]   ;;  %v1288_v48 = vld [vmem:[%s1520_s7 + $0x1c4] ss:$8 sps:$4 sm:$0xff]   ;;  %v1291_v50 = vld [vmem:[%s1520_s7 + $0x1c0] ss:$8 sps:$4 sm:$0xff]  }
  0x29   : > { %824 = vmatprep.subr.bf16.mxu1 %v1246_v20  ;;  %v1292_v51 = vld [vmem:[%s1520_s7 + $0xb4] ss:$8 sps:$4 sm:$0xff]   ;;  %v1296_v53 = vld [vmem:[%s1520_s7 + $0xb0] ss:$8 sps:$4 sm:$0xff]   ;;  %v1298_v55 = vld [vmem:[%s1520_s7 + $0xa4] ss:$8 sps:$4 sm:$0xff]  }
  0x2a   : > { %v1294_v52 = vld [vmem:[%s1520_s7 + $0x1b4] ss:$8 sps:$4 sm:$0xff]   ;;  %v1297_v54 = vld [vmem:[%s1520_s7 + $0x1b0] ss:$8 sps:$4 sm:$0xff]   ;;  %v1300_v56 = vld [vmem:[%s1520_s7 + $0x1a4] ss:$8 sps:$4 sm:$0xff]  }
  0x2b   : > { %772 = vmatpush1.bf16.msra.mxu0 %v1248_v21  ;;  %v1302_v58 = vld [vmem:[%s1520_s7 + $0xa0] ss:$8 sps:$4 sm:$0xff]   ;;  %v1304_v61 = vld [vmem:[%s1520_s7 + $0x94] ss:$8 sps:$4 sm:$0xff]   ;;  %v1308_v1 = vld [vmem:[%s1520_s7 + $0x90] ss:$8 sps:$4 sm:$0xff]  }
  0x2c   : > { %825 = vmatpush1.bf16.msra.mxu1 %v1249_v22  ;;  %773 = vmatprep.subr.bf16.mxu0 %v1250_v23  ;;  %v1303_v59 = vld [vmem:[%s1520_s7 + $0x1a0] ss:$8 sps:$4 sm:$0xff]   ;;  %v1306_v62 = vld [vmem:[%s1520_s7 + $0x194] ss:$8 sps:$4 sm:$0xff]   ;;  %v1309_v3 = vld [vmem:[%s1520_s7 + $0x190] ss:$8 sps:$4 sm:$0xff]  }
  0x2d   : > { %826 = vmatprep.subr.bf16.mxu1 %v1252_v24  ;;  %v1310_v4 = vld [vmem:[%s1520_s7 + $0x84] ss:$8 sps:$4 sm:$0xff]   ;;  %v1314_v7 = vld [vmem:[%s1520_s7 + $0x80] ss:$8 sps:$4 sm:$0xff]   ;;  %v1326_v14 = vld [vmem:[%s1520_s7 + $0x254] ss:$8 sps:$4 sm:$0xff]  }
  0x2e   : > { %v1312_v5 = vld [vmem:[%s1520_s7 + $0x184] ss:$8 sps:$4 sm:$0xff]   ;;  %v1315_v8 = vld [vmem:[%s1520_s7 + $0x180] ss:$8 sps:$4 sm:$0xff]   ;;  %v1324_v17 = vld [vmem:[%s1520_s7 + $0x250] ss:$8 sps:$4 sm:$0xff]  }
  0x2f   : > { %774 = vmatpush1.bf16.msra.mxu0 %v1254_v25  ;;  %v289_v6 = vld [vmem:[%s1520_s7 + $0x260] sm:$0x33]  ;;  %v1319_v12 = vld [vmem:[%s1696_s1 + $0x8] ss:$20 sps:$4 sm:$0xff]   ;;  %v1333_v23 = vld [vmem:[%s1520_s7 + $0x230] ss:$8 sps:$4 sm:$0xff]  }
  0x30   : > { %827 = vmatpush1.bf16.msra.mxu1 %v1255_v26  ;;  %775 = vmatprep.subr.bf16.mxu0 %v1256_v27  ;;  %v1135_v9 = vcombine.high %v289_v6, %v289_v6  ;;  %v1134_v10 = vcombine.low %v289_v6, %v289_v6  ;;  %v1316_v11 = vld [vmem:[%s1696_s1] ss:$20 sps:$4 sm:$0xff]   ;;  %v1329_v18 = vld [vmem:[%s1520_s7 + $0x244] ss:$8 sps:$4 sm:$0xff]   ;;  %v1332_v19 = vld [vmem:[%s1696_s1 + $0x28] ss:$20 sps:$4 sm:$0xff]  }
  0x31   : > { %828 = vmatprep.subr.bf16.mxu1 %v1258_v28  ;;  %v1330_v15 = vld [vmem:[%s1696_s1 + $0x2c] ss:$20 sps:$4 sm:$0xff]   ;;  %v1336_v16 = vld [vmem:[%s1696_s1 + $0x34] ss:$20 sps:$4 sm:$0xff]   ;;  %v1338_v20 = vld [vmem:[%s1696_s1 + $0x30] ss:$20 sps:$4 sm:$0xff]  }
  0x32   : > { %v758_v13 = vsel %vm756_vm0, %v1134_v10, 0  ;;  %v1327_v21 = vld [vmem:[%s1520_s7 + $0x240] ss:$8 sps:$4 sm:$0xff]   ;;  %v1335_v22 = vld [vmem:[%s1520_s7 + $0x234] ss:$8 sps:$4 sm:$0xff]  }
  0x33   : > { %776 = vmatpush1.bf16.msra.mxu0 %v1260_v29  ;;  %v1341_v24 = vld [vmem:[%s1520_s7 + $0x224] ss:$8 sps:$4 sm:$0xff]   ;;  %v1339_v25 = vld [vmem:[%s1520_s7 + $0x220] ss:$8 sps:$4 sm:$0xff]   ;;  %v1344_v26 = vld [vmem:[%s1520_s7 + $0x214] ss:$8 sps:$4 sm:$0xff]  }
  0x34   : > { %829 = vmatpush1.bf16.msra.mxu1 %v1261_v30  ;;  %777 = vmatprep.subr.bf16.mxu0 %v1262_v31  ;;  %v1342_v27 = vld [vmem:[%s1520_s7 + $0x210] ss:$8 sps:$4 sm:$0xff]   ;;  %v1347_v28 = vld [vmem:[%s1520_s7 + $0x204] ss:$8 sps:$4 sm:$0xff]   ;;  %v1345_v29 = vld [vmem:[%s1520_s7 + $0x200] ss:$8 sps:$4 sm:$0xff]  }
  0x35   : > { %830 = vmatprep.subr.bf16.mxu1 %v1264_v32  ;;  %v1349_v30 = vld [vmem:[%s1696_s1 + $0x38] ss:$20 sps:$4 sm:$0xff]   ;;  %s186_s7 = sand.u32 1, %s1410_s13  }
  0x36   : > { %s1046_s26 = sshll.u32 %s186_s7, 6  ;;  %s1650_s15 = scalar_lea.sflag [#allocation3], %s186_s7 }
  0x37   : > { %778 = vmatpush1.bf16.msra.mxu0 %v1266_v33  ;;  %s188_s27 = scalar_lea.vmem [#allocation2], %s1046_s26 }
  0x38   : > { %831 = vmatpush1.bf16.msra.mxu1 %v1267_v34  ;;  %779 = vmatprep.subr.bf16.mxu0 %v1268_v35  ;;  %s962_s29 = sshll.u32 %s188_s27, 4  ;;  %s1646_s29 = int_to_ptr.vmem [resolvable:$true] %s962_s29 }
  0x39   : > { %832 = vmatprep.subr.bf16.mxu1 %v1270_v36  ;;  %s1350_s6 = scalar_lea.vmem %s1646_s29, 1024  ;;  %p1357_p1 = scmp.lt.s32.totalorder %s1646_s29, %s1355_s9 }
  0x3a   : > { %p1351_p12 = scmp.ne.s32.totalorder %s1646_s29, %s1350_s6  ;;  %p1358_p2 = scmp.lt.s32.totalorder %s1356_s10, %s1350_s6 }
  0x3b   : > { %780 = vmatpush2.bf16.msra.mxu0 %v1272_v37 }
  0x3c   : > { %833 = vmatpush2.bf16.msra.mxu1 %v1273_v38  ;;  %781 = vmatprep.subr.bf16.mxu0 %v1274_v39  ;;  %p1352_p13 = pnand %p1351_p12, %p1492_p4  ;;  %p1359_p3 = por %p1358_p2, %p1357_p1 }
  0x3d   : > { %834 = vmatprep.subr.bf16.mxu1 %v1276_v40 }
  0x3e   : > { %p1353_p0 = pneg %p1352_p13 }
  0x3f   : > { %782 = vmatpush2.bf16.msra.mxu0 %v1278_v41 }
  0x40   : > { %835 = vmatpush2.bf16.msra.mxu1 %v1279_v42  ;;  %783 = vmatprep.subr.bf16.mxu0 %v1280_v43  ;;  %p1360_p5 = pnand %p1359_p3, %p1353_p0 }
  0x41   : > { %836 = vmatprep.subr.bf16.mxu1 %v1282_v44 }
  0x43   : > { %784 = vmatpush2.bf16.msra.mxu0 %v1284_v45 }
  0x44   : > { %837 = vmatpush2.bf16.msra.mxu1 %v1285_v46  ;;  %785 = vmatprep.subr.bf16.mxu0 %v1286_v47 }
  0x45   : > { %838 = vmatprep.subr.bf16.mxu1 %v1288_v48 }
  0x47   : > { %786 = vmatpush2.bf16.msra.mxu0 %v1290_v49 }
  0x48   : > { %839 = vmatpush2.bf16.msra.mxu1 %v1291_v50  ;;  %787 = vmatprep.subr.bf16.mxu0 %v1292_v51 }
  0x49   : > { %840 = vmatprep.subr.bf16.mxu1 %v1294_v52 }
  0x4b   : > { %788 = vmatpush2.bf16.msra.mxu0 %v1296_v53 }
  0x4c   : > { %841 = vmatpush2.bf16.msra.mxu1 %v1297_v54  ;;  %789 = vmatprep.subr.bf16.mxu0 %v1298_v55 }
  0x4d   : > { %842 = vmatprep.subr.bf16.mxu1 %v1300_v56 }
  0x4f   : > { %790 = vmatpush2.bf16.msra.mxu0 %v1302_v58 }
  0x50   : > { %843 = vmatpush2.bf16.msra.mxu1 %v1303_v59  ;;  %791 = vmatprep.subr.bf16.mxu0 %v1304_v61 }
  0x51   : > { %844 = vmatprep.subr.bf16.mxu1 %v1306_v62 }
  0x53   : > { %792 = vmatpush2.bf16.msra.mxu0 %v1308_v1 }
  0x54   : > { %845 = vmatpush2.bf16.msra.mxu1 %v1309_v3  ;;  %793 = vmatprep.subr.bf16.mxu0 %v1310_v4 }
  0x55   : > { %846 = vmatprep.subr.bf16.mxu1 %v1312_v5 }
  0x57   : > { %794 = vmatpush2.bf16.msra.mxu0 %v1314_v7 }
  0x58   : > { %847 = vmatpush2.bf16.msra.mxu1 %v1315_v8  ;;  %1136 = vmatprep.subr.msk.bf16.mxu0 %vm756_vm0, %v1135_v9 }
  0x59   : > { %1145 = vmatprep.subr.msk.bf16.mxu1 %vm756_vm0, %v1135_v9 }
  0x5a   : > { %796 = vmatmul.mubr.bf16.vlgmr.msra.gmra.mxu0 %v1316_v11 }
  0x5b   : > { %849 = vmatmul.mubr.bf16.vlgmr.msra.gmra.mxu1 %v1319_v12  ;;  %872 = vmatpush1.bf16.msra.mxu0 %v758_v13 }
  0x5c   : > { %1152 = vmatpush1.bf16.msra.mxu1 %v758_v13  ;;  %873 = vmatprep.subr.bf16.mxu0 %v1326_v14 }
  0x5d   : > { %1146 = vmatprep.subr.bf16.mxu1 %v1326_v14  ;;  %805 = vmatprep.mubr.bf16.mxu0 %v1330_v15 }
  0x5e   : > { %858 = vmatprep.mubr.bf16.mxu1 %v1336_v16 }
  0x5f   : > { %874 = vmatpush1.bf16.msra.mxu0 %v1324_v17 }
  0x60   : > { %1153 = vmatpush1.bf16.msra.mxu1 %v1324_v17  ;;  %875 = vmatprep.subr.bf16.mxu0 %v1329_v18 }
  0x61   : > { %1147 = vmatprep.subr.bf16.mxu1 %v1329_v18 }
  0x62   : > { %806 = vmatmul.mubr.bf16.gmra.mxu0 %v1332_v19 }
  0x63   : > { %859 = vmatmul.mubr.bf16.gmra.mxu1 %v1338_v20  ;;  %876 = vmatpush1.bf16.msra.mxu0 %v1327_v21 }
  0x64   : > { %1154 = vmatpush1.bf16.msra.mxu1 %v1327_v21  ;;  %877 = vmatprep.subr.bf16.mxu0 %v1335_v22 }
  0x65   : > { %1148 = vmatprep.subr.bf16.mxu1 %v1335_v22  ;;  %901 = vmatprep.mubr.bf16.mxu0 %v1428_v2 }
  0x66   : > { %911 = vmatprep.mubr.bf16.mxu1 %v1428_v2  ;;  %v1348_v2 = vld [vmem:[%s1696_s1 + $0x10] ss:$20 sps:$4 sm:$0xff]  }
  0x67   : > { %878 = vmatpush1.bf16.msra.mxu0 %v1333_v23 }
  0x68   : > { %1155 = vmatpush1.bf16.msra.mxu1 %v1333_v23  ;;  %879 = vmatprep.subr.bf16.mxu0 %v1341_v24 }
  0x69   : > { %1149 = vmatprep.subr.bf16.mxu1 %v1341_v24 }
  0x6b   : > { %880 = vmatpush1.bf16.msra.mxu0 %v1339_v25 }
  0x6c   : > { %1156 = vmatpush1.bf16.msra.mxu1 %v1339_v25  ;;  %881 = vmatprep.subr.bf16.mxu0 %v1344_v26 }
  0x6d   : > { %1150 = vmatprep.subr.bf16.mxu1 %v1344_v26 }
  0x6f   : > { %882 = vmatpush1.bf16.msra.mxu0 %v1342_v27 }
  0x70   : > { %1157 = vmatpush1.bf16.msra.mxu1 %v1342_v27  ;;  %883 = vmatprep.subr.bf16.mxu0 %v1347_v28 }
  0x71   : > { %1151 = vmatprep.subr.bf16.mxu1 %v1347_v28 }
  0x73   : > { %884 = vmatpush1.bf16.msra.mxu0 %v1345_v29 }
  0x74   : > { %1158 = vmatpush1.bf16.msra.mxu1 %v1345_v29 }
  0x76   : > { %1137 = vmatmul.mubr.msk.bf16.vlgmr.msra.gmra.mxu0 %vm749_vm1, %v1348_v2 }
  0x77   : > { %1138 = vmatmul.mubr.msk.bf16.vlgmr.msra.gmra.mxu1 %vm749_vm1, %v1349_v30 }
  0x92   : > { %v297_v42 = vpop.permute.xlu0 %296  ;;  %v307_v44 = vpop.permute.xlu1 %306 }
  0x98   : > { %v302_v49 = vpop.permute.xlu0 %301 }
  0x99   : > { %v312_v52 = vpop.permute.xlu1 %311 }
 0x11a   : > { %v797_v31 = vpop.f32.mrf.mxu0 }
 0x11b   : > { %v850_v32 = vpop.f32.mrf.mxu1  ;;  %v798_v47 = vadd.f32 %v797_v31, %v297_v42 }
 0x11c   : > { %v799_v33 = vpop.f32.mrf.mxu0 }
 0x11d   : > { %v852_v34 = vpop.f32.mrf.mxu1  ;;  %v800_v50 = vadd.f32 %v799_v33, %v297_v42  ;;  %v851_v55 = vadd.f32 %v850_v32, %v798_v47 }
 0x11e   : > { %v801_v35 = vpop.f32.mrf.mxu0 }
 0x11f   : > { %v854_v36 = vpop.f32.mrf.mxu1  ;;  %v802_v57 = vadd.f32 %v801_v35, %v302_v49  ;;  %v853_v63 = vadd.f32 %v852_v34, %v800_v50 }
 0x120   : > { %v803_v37 = vpop.f32.mrf.mxu0 }
 0x121   : > { %v856_v38 = vpop.f32.mrf.mxu1  ;;  %v804_v58 = vadd.f32 %v803_v37, %v302_v49  ;;  %v855_v10 = vadd.f32 %v854_v36, %v802_v57 }
 0x122   : > { %v807_v39 = vpop.f32.mrf.mxu0 }
 0x123   : > { %v860_v40 = vpop.f32.mrf.mxu1  ;;  %v808_v48 = vadd.f32 %v807_v39, %v307_v44  ;;  %v857_v11 = vadd.f32 %v856_v38, %v804_v58 }
 0x124   : > { %v809_v41 = vpop.f32.mrf.mxu0 }
 0x125   : > { %v862_v43 = vpop.f32.mrf.mxu1  ;;  %v810_v51 = vadd.f32 %v809_v41, %v307_v44  ;;  %v861_v56 = vadd.f32 %v860_v40, %v808_v48 }
 0x126   : > { %v811_v45 = vpop.f32.mrf.mxu0 }
 0x127   : > { %v864_v46 = vpop.f32.mrf.mxu1  ;;  %v812_v59 = vadd.f32 %v811_v45, %v312_v52  ;;  %v863_v0 = vadd.f32 %v862_v43, %v810_v51 }
 0x128   : > { %v813_v53 = vpop.f32.mrf.mxu0 }
 0x129   : > { %v866_v54 = vpop.f32.mrf.mxu1  ;;  %v814_v60 = vadd.f32 %v813_v53, %v312_v52  ;;  %v865_v12 = vadd.f32 %v864_v46, %v812_v59 }
 0x12b   : > { %v867_v13 = vadd.f32 %v866_v54, %v814_v60 }
 0x136   : > { %v903_v61 = vpop.f32.mrf.mxu0 }
 0x137   : > { %v913_v62 = vpop.f32.mrf.mxu1  ;;  %v904_v1 = vadd.f32 %v903_v61, %v851_v55 }
 0x138   : > { %v914_v3 = vadd.f32 %v913_v62, %v861_v56  ;;  %v905_v4 = vpop.f32.mrf.mxu0 }
 0x139   : > { %v915_v5 = vpop.f32.mrf.mxu1  ;;  %v922_v6 = vmul.f32 0.01, %v904_v1  ;;  %v906_v8 = vadd.f32 %v905_v4, %v853_v63 }
 0x13a   : > { %v926_v7 = vmul.f32 0.01, %v914_v3  ;;  %v916_v9 = vadd.f32 %v915_v5, %v863_v0  ;;  %v907_v14 = vpop.f32.mrf.mxu0 }
 0x13b   : > { %v917_v15 = vpop.f32.mrf.mxu1  ;;  %v930_v16 = vmax.f32 %v904_v1, %v922_v6  ;;  %v923_v18 = vmul.f32 0.01, %v906_v8  ;;  %v908_v20 = vadd.f32 %v907_v14, %v855_v10 }
 0x13c   : > { %v934_v17 = vmax.f32 %v914_v3, %v926_v7  ;;  %v927_v19 = vmul.f32 0.01, %v916_v9  ;;  %v918_v21 = vadd.f32 %v917_v15, %v865_v12  ;;  %v909_v22 = vpop.f32.mrf.mxu0 }
 0x13d   : > { %v919_v23 = vpop.f32.mrf.mxu1  ;;  %938 = vst [vmem:[%s188_s27] sm:$0xff] %v930_v16  ;;  %v931_v24 = vmax.f32 %v906_v8, %v923_v18  ;;  %v910_v26 = vadd.f32 %v909_v22, %v857_v11  ;;  %v924_v28 = vmul.f32 0.01, %v908_v20 }
 0x13e   : > { %942 = vst [vmem:[%s188_s27 + $0x20] sm:$0xff] %v934_v17  ;;  %v935_v25 = vmax.f32 %v916_v9, %v927_v19  ;;  %v920_v27 = vadd.f32 %v919_v23, %v867_v13  ;;  %v928_v29 = vmul.f32 0.01, %v918_v21 }
 0x13f   : > { %939 = vst [vmem:[%s188_s27 + $0x8] sm:$0xff] %v931_v24  ;;  %v925_v2 = vmul.f32 0.01, %v910_v26  ;;  %v932_v31 = vmax.f32 %v908_v20, %v924_v28 }
 0x140   : > { %943 = vst [vmem:[%s188_s27 + $0x28] sm:$0xff] %v935_v25  ;;  %v929_v30 = vmul.f32 0.01, %v920_v27  ;;  %v936_v32 = vmax.f32 %v918_v21, %v928_v29 }
 0x141   : > { %v933_v33 = vmax.f32 %v910_v26, %v925_v2  ;;  %940 = vst [vmem:[%s188_s27 + $0x10] sm:$0xff] %v932_v31 }
 0x142   : > { %v937_v34 = vmax.f32 %v920_v27, %v929_v30  ;;  %944 = vst [vmem:[%s188_s27 + $0x30] sm:$0xff] %v936_v32 }
 0x143   : > { %941 = vst [vmem:[%s188_s27 + $0x18] sm:$0xff] %v933_v33 }
 0x144   : > { %945 = vst [vmem:[%s188_s27 + $0x38] sm:$0xff] %v937_v34 }
 0x145   : > { %1363 = shalt.err (!%p1360_p5)
}
 0x146   : > { %s1364_s11 = scalar_lea.hbm %s1644_s5, 1024  ;;  %s1368_s21 = scalar_lea.hbm %s1698_s3, 2048 }
 0x147   : > { %p1365_p6 = scmp.ne.s32.totalorder %s1644_s5, %s1364_s11  ;;  %p1369_p10 = scmp.lt.s32.totalorder %s1644_s5, %s1698_s3 }
 0x148   : > { %p1370_p11 = scmp.lt.s32.totalorder %s1368_s21, %s1364_s11 }
 0x149   : > { %p1366_p7 = pnand %p1365_p6, %p1492_p4 }
 0x14a   : > { %p1371_p12 = por %p1370_p11, %p1369_p10 }
 0x14b   : > { %p1367_p9 = pneg %p1366_p7 }
 0x14d   : > { %p1372_p13 = pnand %p1371_p12, %p1367_p9 }
 0x14f   : > { %1375 = shalt.err (!%p1372_p13)
}
 0x150   : > { %s1430_s26 = smov 256   ;;  %s1431_s27 = smov 16  }
 0x151   : > { %1160 = dma.vmem_to_hbm [thread:$0]  (%p1492_p4), %s1646_s29, 1024, %s1644_s5, %s1650_s15, %s1430_s26, %s1430_s26, %s1431_s27  }
 0x152 PF: > { %p1166_p0 = scmp.ge.s32.totalorder %s1426_s17, 2  ;;  %s977_s28 = sand.u32 1, %s1406_s12  }
 0x153   : > { %s978_s30 = scalar_lea.sflag [#allocation3], %s977_s28 }
 0x154   : > { %p1163_p1 = pnand %p1166_p0, %p1499_p8 }
 0x156   : > { %p1164_p2 = pneg %p1163_p1 }
 0x158   : > { %1401 = dma.done.wait (%p1164_p2), %s978_s30, 1024  }
 0x159   : > { %1403 = vsyncadd (%p1164_p2), %s978_s30, 4294966272  ;;  %s16_s17 = sadd.s32 1, %s1426_s17   ;;  %s1701_s12 = smov %s1410_s13 }
 0x15a   : > { %p13_p3 = scmp.ge.s32.totalorder %s16_s17, 4   ;;  %s1702_s13 = smov %s1414_s14 }
 0x15b   : > { %s1703_s14 = smov %s1505_s25  ;;  %s1704_s15 = smov %s1422_s16 }
 0x15c   : > { %s1705_s16 = smov %s1707_s20  ;;  %15 = sbr.rel (!%p13_p3) target bundleno = 4 (0x4), region = 67 }
 0x161   :  { %983 = vsyncpa [#allocation3], 1 }
 0x162   :  { %985 = vsyncpa [#allocation3 + $0x1], 1 }

</bundles_post_ra>
